<compile_context>
chip_gen: v7x
topology: tpu7x:2x2x1
jax: 0.10.0
libtpu: 0.0.40
codegen_flags: <defaults>
</compile_context>

<pallas_src>
import jax
import jax.numpy as jnp
from jax import lax
from jax.experimental import pallas as pl
from jax.experimental.pallas import tpu as pltpu

EPS = 1e-12
LANES = 128


# ----------------------------- kernel bodies ------------------------------ #

def _forward_block(x, w1, b1, w2, b2, w3, b3, norm_fn):
    # layer 1: Linear(state, 15) + relu + normalize(dim=0 within slice)
    h = jnp.dot(x, w1, preferred_element_type=jnp.float32) + b1
    h = jnp.maximum(h, 0.0)
    h = norm_fn(h)
    # layer 2: Linear(15, 30) + relu + normalize(dim=0 within slice)
    h = jnp.dot(h, w2, preferred_element_type=jnp.float32) + b2
    h = jnp.maximum(h, 0.0)
    h = norm_fn(h)
    # layer 3: Linear(30, action_pad) + relu (padded columns stay exactly 0)
    h = jnp.dot(h, w3, preferred_element_type=jnp.float32) + b3
    h = jnp.maximum(h, 0.0)
    return h


def _norm_full(h):
    # 1 / max(||h||_2 along dim 0, eps) == rsqrt(max(sum(h^2, dim 0), eps^2))
    sumsq = jnp.sum(h * h, axis=0, keepdims=True)
    return h * lax.rsqrt(jnp.maximum(sumsq, EPS * EPS))


def dqn_kernel_single(x_ref, w1_ref, b1_ref, w2_ref, b2_ref, w3_ref, b3_ref,
                      o_ref):
    out = _forward_block(
        x_ref[...],
        w1_ref[...], b1_ref[...],
        w2_ref[...], b2_ref[...],
        w3_ref[...], b3_ref[...],
        _norm_full,
    )
    o_ref[...] = out.astype(o_ref.dtype)


def dqn_kernel_grouped(g_ref, x_ref, w1_ref, b1_ref, w2_ref, b2_ref, w3_ref,
                       b3_ref, o_ref):
    g = g_ref[...]  # (R, R) block-diagonal ones: rows of the same slice

    def norm_grouped(h):
        # Per-slice dim-0 sum-of-squares, broadcast back to each row via MXU.
        sumsq = jnp.dot(g, h * h, preferred_element_type=jnp.float32)
        return h * lax.rsqrt(jnp.maximum(sumsq, EPS * EPS))

    out = _forward_block(
        x_ref[...],
        w1_ref[...], b1_ref[...],
        w2_ref[...], b2_ref[...],
        w3_ref[...], b3_ref[...],
        norm_grouped,
    )
    o_ref[...] = out.astype(o_ref.dtype)


# ------------------------------ param prep -------------------------------- #

def prepare_params(params):
    """One-time prep: transpose weights to (in, out), biases to (1, out), and
    zero-pad the final layer's output dim to a multiple of 128 lanes so the
    kernel's stores are lane-dense (unmasked vst)."""
    w1, b1 = params["w1"], params["b1"]   # (15, S), (15,)
    w2, b2 = params["w2"], params["b2"]   # (30, 15), (30,)
    w3, b3 = params["w3"], params["b3"]   # (A, 30), (A,)
    action_size = int(w3.shape[0])
    a_pad = ((action_size + LANES - 1) // LANES) * LANES

    w3p = jnp.zeros((w3.shape[1], a_pad), jnp.float32).at[:, :action_size].set(w3.T)
    b3p = jnp.zeros((1, a_pad), jnp.float32).at[:, :action_size].set(b3.reshape(1, -1))

    return {
        "w1": w1.T, "b1": b1.reshape(1, -1),
        "w2": w2.T, "b2": b2.reshape(1, -1),
        "w3": w3p, "b3": b3p,
        "action_size": action_size, "a_pad": a_pad,
    }


# ------------------------------- wrappers ---------------------------------- #

def dqn_net_forward(x, prepared):
    """Single forward pass (latency floor at tiny B — prefer the stacked path
    for repeated calls).  x: (B, state_size) f32.
    Returns the lane-padded output (B, a_pad); slice [:, :action_size] in the
    consumer (kept padded here so no extra XLA copy op per call)."""
    B = x.shape[0]
    a_pad = prepared["a_pad"]
    args = (x, prepared["w1"], prepared["b1"], prepared["w2"], prepared["b2"],
            prepared["w3"], prepared["b3"])

    vmem = pl.BlockSpec(memory_space=pltpu.MemorySpace.VMEM)
    return pl.pallas_call(
        dqn_kernel_single,
        out_shape=jax.ShapeDtypeStruct((B, a_pad), jnp.float32),
        in_specs=[vmem] * len(args),
        out_specs=vmem,
    )(*args)


def dqn_net_forward_stacked(xs, prepared, *, grid_steps=None):
    """Launch-amortized forward over a stack of N independent (B, S) inputs.

    The N slices are flattened to (N*B, S) rows and split into `grid_steps`
    fused blocks (default 2 so both v7x TensorCores get work; measured no-op
    on 1-TC v5e/v6e).  Normalization is per-slice over its own B rows via the
    block-diagonal group matrix, so semantics match N independent module calls.
    Returns the lane-padded output (N, B, a_pad)."""
    N, B, S = xs.shape
    a_pad = prepared["a_pad"]

    if grid_steps is None:
        grid_steps = 2
    # Fall back to a single fused step if the row-block would violate the
    # sublane (8) constraint or not divide N evenly.
    if N % grid_steps != 0 or ((N // grid_steps) * B) % 8 != 0:
        grid_steps = 1
    kn = N // grid_steps
    rows = kn * B          # rows per grid step
    # NOTE: if N ever grows large, cap `rows` so double-buffered blocks stay
    # well under VMEM (64 MiB/TC on v7x, 128 MiB on v5e/v6e); never binds here.

    x2 = xs.reshape(N * B, S)

    # Block-diagonal group matrix: 1 where two rows belong to the same slice.
    slice_id = jnp.arange(rows, dtype=jnp.int32) // B
    g = (slice_id[:, None] == slice_id[None, :]).astype(jnp.float32)

    w1, b1 = prepared["w1"], prepared["b1"]
    w2, b2 = prepared["w2"], prepared["b2"]
    w3, b3 = prepared["w3"], prepared["b3"]

    def full_spec(shape):
        return pl.BlockSpec(shape, lambda n: (0,) * len(shape))

    out2 = pl.pallas_call(
        dqn_kernel_grouped,
        out_shape=jax.ShapeDtypeStruct((N * B, a_pad), jnp.float32),
        grid=(grid_steps,),
        in_specs=[
            full_spec(g.shape),
            pl.BlockSpec((rows, S), lambda n: (n, 0)),     # x row-block
            full_spec(w1.shape), full_spec(b1.shape),
            full_spec(w2.shape), full_spec(b2.shape),
            full_spec(w3.shape), full_spec(b3.shape),
        ],
        out_specs=pl.BlockSpec((rows, a_pad), lambda n: (n, 0)),
        compiler_params=pltpu.CompilerParams(
            dimension_semantics=("parallel",),   # independent slices / TCs
        ),
    )(g, x2, w1, b1, w2, b2, w3, b3)
    return out2.reshape(N, B, a_pad)


# --------------------------- init + reference ------------------------------ #

def init_params(key, state_size, action_size):
    """Deterministic synthetic init mimicking the module's fanin_init
    (torch .uniform_(v) == uniform in [v, 1), v = 1/sqrt(fan=out_features))
    for weights; small uniform biases (torch default-style)."""
    ks = jax.random.split(key, 6)

    def fanin_w(k, out_f, in_f):
        v = 1.0 / jnp.sqrt(jnp.float32(out_f))
        return jax.random.uniform(k, (out_f, in_f), jnp.float32, minval=v, maxval=1.0)

    def default_b(k, out_f, in_f):
        bound = 1.0 / jnp.sqrt(jnp.float32(in_f))
        return jax.random.uniform(k, (out_f,), jnp.float32, minval=-bound, maxval=bound)

    return {
        "w1": fanin_w(ks[0], 15, state_size),
        "b1": default_b(ks[1], 15, state_size),
        "w2": fanin_w(ks[2], 30, 15),
        "b2": default_b(ks[3], 30, 15),
        "w3": fanin_w(ks[4], action_size, 30),
        "b3": default_b(ks[5], action_size, 30),
    }


def reference_forward(x, p):
    h = jnp.maximum(x @ p["w1"].T + p["b1"], 0.0)
    h = h / jnp.maximum(jnp.linalg.norm(h, axis=0, keepdims=True), EPS)
    h = jnp.maximum(h @ p["w2"].T + p["b2"], 0.0)
    h = h / jnp.maximum(jnp.linalg.norm(h, axis=0, keepdims=True), EPS)
    h = jnp.maximum(h @ p["w3"].T + p["b3"], 0.0)
    return h


# ---------------------------------- main ----------------------------------- #

if __name__ == "__main__":
    state_size = 16
    action_size = 8
    batch = 4
    n_stack = 8  # number of independent env batches amortized in one call

    key = jax.random.PRNGKey(0)
    k_x, k_xs, k_p = jax.random.split(key, 3)
    x = jax.random.normal(k_x, (batch, state_size), dtype=jnp.float32)
    xs = jax.random.normal(k_xs, (n_stack, batch, state_size), dtype=jnp.float32)
    params = init_params(k_p, state_size, action_size)
    prepared = prepare_params(params)
    A = prepared["action_size"]

    # single forward (padded output; consumer slices)
    out_pad = jax.block_until_ready(dqn_net_forward(x, prepared))
    assert out_pad.shape == (batch, prepared["a_pad"])
    out = out_pad[:, :A]
    ref = reference_forward(x, params)
    assert jnp.allclose(out, ref, atol=1e-5, rtol=1e-5), "mismatch vs JAX reference"
    # padded lanes are exact zeros
    assert jnp.all(out_pad[:, A:] == 0.0)

    # stacked (launch-amortized, N-fused) forward
    outs_pad = jax.block_until_ready(dqn_net_forward_stacked(xs, prepared))
    assert outs_pad.shape == (n_stack, batch, prepared["a_pad"])
    outs = outs_pad[:, :, :A]
    refs = jax.vmap(lambda xi: reference_forward(xi, params))(xs)
    assert jnp.allclose(outs, refs, atol=1e-5, rtol=1e-5), "stacked mismatch vs JAX reference"
    assert jnp.all(outs_pad[:, :, A:] == 0.0)

    print("KERNEL_OK")
</pallas_src>

<mosaic_0001>
module attributes {stable_mosaic.version = 11 : i64} {
  func.func @dqn_kernel_single(%arg0: memref<4x16xf32, #tpu.memory_space<vmem>>, %arg1: memref<16x15xf32, #tpu.memory_space<vmem>>, %arg2: memref<1x15xf32, #tpu.memory_space<vmem>>, %arg3: memref<15x30xf32, #tpu.memory_space<vmem>>, %arg4: memref<1x30xf32, #tpu.memory_space<vmem>>, %arg5: memref<30x128xf32, #tpu.memory_space<vmem>>, %arg6: memref<1x128xf32, #tpu.memory_space<vmem>>, %arg7: memref<4x128xf32, #tpu.memory_space<vmem>>) attributes {dimension_semantics = [], scalar_prefetch = 0 : i64, scratch_operands = 0 : i64, tpu.core_type = #tpu.core_type<tc>} {
    %c0 = arith.constant 0 : index
    %c0_0 = arith.constant 0 : index
    %0 = vector.load %arg0[%c0, %c0_0] : memref<4x16xf32, #tpu.memory_space<vmem>>, vector<4x16xf32>
    %c0_1 = arith.constant 0 : index
    %c0_2 = arith.constant 0 : index
    %1 = vector.load %arg1[%c0_1, %c0_2] : memref<16x15xf32, #tpu.memory_space<vmem>>, vector<16x15xf32>
    %c0_3 = arith.constant 0 : index
    %c0_4 = arith.constant 0 : index
    %2 = vector.load %arg2[%c0_3, %c0_4] : memref<1x15xf32, #tpu.memory_space<vmem>>, vector<1x15xf32>
    %c0_5 = arith.constant 0 : index
    %c0_6 = arith.constant 0 : index
    %3 = vector.load %arg3[%c0_5, %c0_6] : memref<15x30xf32, #tpu.memory_space<vmem>>, vector<15x30xf32>
    %c0_7 = arith.constant 0 : index
    %c0_8 = arith.constant 0 : index
    %4 = vector.load %arg4[%c0_7, %c0_8] : memref<1x30xf32, #tpu.memory_space<vmem>>, vector<1x30xf32>
    %c0_9 = arith.constant 0 : index
    %c0_10 = arith.constant 0 : index
    %5 = vector.load %arg5[%c0_9, %c0_10] : memref<30x128xf32, #tpu.memory_space<vmem>>, vector<30x128xf32>
    %c0_11 = arith.constant 0 : index
    %c0_12 = arith.constant 0 : index
    %6 = vector.load %arg6[%c0_11, %c0_12] : memref<1x128xf32, #tpu.memory_space<vmem>>, vector<1x128xf32>
    %cst = arith.constant dense<0.000000e+00> : vector<4x15xf32>
    %7 = tpu.matmul %0, %1, %cst {dimension_numbers = #tpu.dot_dimension_numbers<[1], [0], [0], [1], [0, 0, 1, 1], [], []>} : vector<4x16xf32>, vector<16x15xf32>, vector<4x15xf32> -> vector<4x15xf32>
    %8 = vector.broadcast %2 : vector<1x15xf32> to vector<4x15xf32>
    %9 = arith.addf %7, %8 : vector<4x15xf32>
    %cst_13 = arith.constant 0.000000e+00 : f32
    %10 = vector.broadcast %cst_13 : f32 to vector<4x15xf32>
    %11 = arith.maximumf %9, %10 : vector<4x15xf32>
    %12 = arith.mulf %11, %11 : vector<4x15xf32>
    %cst_14 = arith.constant dense<0.000000e+00> : vector<15xf32>
    %13 = vector.multi_reduction <add>, %12, %cst_14 [0] : vector<4x15xf32> to vector<15xf32>
    %14 = vector.shape_cast %13 : vector<15xf32> to vector<1x15xf32>
    %cst_15 = arith.constant 1.000000e-24 : f32
    %15 = vector.broadcast %cst_15 : f32 to vector<1x15xf32>
    %16 = arith.maximumf %14, %15 : vector<1x15xf32>
    %17 = math.rsqrt %16 : vector<1x15xf32>
    %18 = vector.broadcast %17 : vector<1x15xf32> to vector<4x15xf32>
    %19 = arith.mulf %11, %18 : vector<4x15xf32>
    %cst_16 = arith.constant dense<0.000000e+00> : vector<4x30xf32>
    %20 = tpu.matmul %19, %3, %cst_16 {dimension_numbers = #tpu.dot_dimension_numbers<[1], [0], [0], [1], [0, 0, 1, 1], [], []>} : vector<4x15xf32>, vector<15x30xf32>, vector<4x30xf32> -> vector<4x30xf32>
    %21 = vector.broadcast %4 : vector<1x30xf32> to vector<4x30xf32>
    %22 = arith.addf %20, %21 : vector<4x30xf32>
    %cst_17 = arith.constant 0.000000e+00 : f32
    %23 = vector.broadcast %cst_17 : f32 to vector<4x30xf32>
    %24 = arith.maximumf %22, %23 : vector<4x30xf32>
    %25 = arith.mulf %24, %24 : vector<4x30xf32>
    %cst_18 = arith.constant dense<0.000000e+00> : vector<30xf32>
    %26 = vector.multi_reduction <add>, %25, %cst_18 [0] : vector<4x30xf32> to vector<30xf32>
    %27 = vector.shape_cast %26 : vector<30xf32> to vector<1x30xf32>
    %cst_19 = arith.constant 1.000000e-24 : f32
    %28 = vector.broadcast %cst_19 : f32 to vector<1x30xf32>
    %29 = arith.maximumf %27, %28 : vector<1x30xf32>
    %30 = math.rsqrt %29 : vector<1x30xf32>
    %31 = vector.broadcast %30 : vector<1x30xf32> to vector<4x30xf32>
    %32 = arith.mulf %24, %31 : vector<4x30xf32>
    %cst_20 = arith.constant dense<0.000000e+00> : vector<4x128xf32>
    %33 = tpu.matmul %32, %5, %cst_20 {dimension_numbers = #tpu.dot_dimension_numbers<[1], [0], [0], [1], [0, 0, 1, 1], [], []>} : vector<4x30xf32>, vector<30x128xf32>, vector<4x128xf32> -> vector<4x128xf32>
    %34 = vector.broadcast %6 : vector<1x128xf32> to vector<4x128xf32>
    %35 = arith.addf %33, %34 : vector<4x128xf32>
    %cst_21 = arith.constant 0.000000e+00 : f32
    %36 = vector.broadcast %cst_21 : f32 to vector<4x128xf32>
    %37 = arith.maximumf %35, %36 : vector<4x128xf32>
    %c0_22 = arith.constant 0 : index
    %c0_23 = arith.constant 0 : index
    %38 = vector.load %arg7[%c0_22, %c0_23] : memref<4x128xf32, #tpu.memory_space<vmem>>, vector<4x128xf32>
    tpu.vector_store %arg7[%c0_22, %c0_23], %37 {strides = array<i32>} : memref<4x128xf32, #tpu.memory_space<vmem>>, vector<4x128xf32>,
    return
  }
}

</mosaic_0001>

<bundles_post_ra>
// kernel: tpu_custom_call.1
= control target key start
LH: loop header
LB: loop body
LE: loop exit
PB: predicated region body
PF: predicated region fallthrough
CT: control target
= control target key end

     0   :  { %12 = vsyncpa [#allocation3], 0  ;;  %s707_s0 = inlined_call_operand.hbm [shape: f32[4,16], index: 0, kind: input, shape index: {}]   ;;  %s708_s1 = inlined_call_operand.hbm [shape: f32[16,15], index: 1, kind: input, shape index: {}]   ;;  %s709_s2 = inlined_call_operand.vmem [shape: f32[1,15], index: 2, kind: input, shape index: {}]   ;;  %s710_s3 = inlined_call_operand.hbm [shape: f32[15,30], index: 3, kind: input, shape index: {}]   ;;  %s711_s4 = inlined_call_operand.vmem [shape: f32[1,30], index: 4, kind: input, shape index: {}]   ;;  %s712_s5 = inlined_call_operand.hbm [shape: f32[30,128], index: 5, kind: input, shape index: {}]   ;;  %s713_s6 = inlined_call_operand.vmem [shape: f32[1,128], index: 6, kind: input, shape index: {}]   ;;  %s714_s7 = inlined_call_operand.hbm [shape: f32[4,128], index: 7, kind: output, shape index: {}]  }
   0x1   :  { %13 = vsyncpa [#allocation6], 0 }
   0x2   :  { %14 = vsyncpa [#allocation9], 0 }
   0x3   :  { %15 = vsyncpa [#allocation4], 0  ;;  %s576_s24 = smov [#allocation5]   ;;  %s458_s28 = scalar_lea.hbm %s708_s1, 256 }
   0x4   :  { %s31_s25 = sshll.u32 %s576_s24, 4  ;;  %p459_p0 = scmp.ne.s32.totalorder %s708_s1, %s458_s28  ;;  %s32_s25 = int_to_ptr.vmem [resolvable:$true] %s31_s25 }
   0x5   :  { %p462_p1 = scmp.lt.u32.totalorder %s458_s28, %s708_s1 }
   0x7   :  { %p464_p2 = pnand %p462_p1, %p459_p0 }
   0x9   :  { %467 = shalt.err (!%p464_p2)
}
   0xa   :  { %s468_s10 = scalar_lea.vmem %s32_s25, 256  ;;  %p473_p4 = scmp.lt.s32.totalorder %s32_s25, %s32_s25 }
   0xb   :  { %p469_p3 = scmp.ne.s32.totalorder %s32_s25, %s468_s10  ;;  %p474_p5 = scmp.lt.s32.totalorder %s468_s10, %s468_s10 }
   0xd   :  { %p475_p6 = por %p474_p5, %p473_p4 }
   0xf   :  { %p476_p7 = pnand %p475_p6, %p469_p3 }
  0x11   :  { %479 = shalt.err (!%p476_p7)
}
  0x12   :  { %s577_s11 = smov 128   ;;  %s578_s12 = smov 8  }
  0x13   :  { %37 = dma.hbm_to_vmem [thread:$0]  %s708_s1, 256, %s32_s25, [#allocation6], %s577_s11, %s577_s11, %s578_s12  }
  0x14   :  { %s579_s15 = smov [#allocation2]   ;;  %s580_s17 = smov [#allocation7]  }
  0x15   :  { %s22_s16 = sshll.u32 %s579_s15, 4  ;;  %s45_s18 = sshll.u32 %s580_s17, 4  ;;  %s23_s16 = int_to_ptr.vmem [resolvable:$true] %s22_s16  ;;  %s46_s18 = int_to_ptr.vmem [resolvable:$true] %s45_s18 }
  0x16   :  { %s480_s21 = scalar_lea.hbm %s707_s0, 64 }
  0x17   :  { %p481_p8 = scmp.ne.s32.totalorder %s707_s0, %s480_s21  ;;  %p484_p9 = scmp.lt.u32.totalorder %s480_s21, %s707_s0 }
  0x19   :  { %p486_p10 = pnand %p484_p9, %p481_p8 }
  0x1b   :  { %489 = shalt.err (!%p486_p10)
}
  0x1c   :  { %s490_s1 = scalar_lea.vmem %s23_s16, 64  ;;  %p495_p12 = scmp.lt.s32.totalorder %s23_s16, %s23_s16 }
  0x1d   :  { %p491_p11 = scmp.ne.s32.totalorder %s23_s16, %s490_s1  ;;  %p496_p13 = scmp.lt.s32.totalorder %s490_s1, %s490_s1 }
  0x1f   :  { %p497_p0 = por %p496_p13, %p495_p12 }
  0x21   :  { %p498_p1 = pnand %p497_p0, %p491_p11 }
  0x23   :  { %501 = shalt.err (!%p498_p1)
}
  0x24   :  { %25 = dma.hbm_to_vmem [thread:$0]  %s707_s0, 64, %s23_s16, [#allocation3]  }
  0x25   :  { %s502_s30 = scalar_lea.hbm %s710_s3, 256 }
  0x26   :  { %p503_p2 = scmp.ne.s32.totalorder %s710_s3, %s502_s30  ;;  %p506_p3 = scmp.lt.u32.totalorder %s502_s30, %s710_s3 }
  0x28   :  { %p508_p4 = pnand %p506_p3, %p503_p2 }
  0x2a   :  { %511 = shalt.err (!%p508_p4)
}
  0x2b   :  { %s512_s14 = scalar_lea.vmem %s46_s18, 256  ;;  %p517_p6 = scmp.lt.s32.totalorder %s46_s18, %s46_s18 }
  0x2c   :  { %p513_p5 = scmp.ne.s32.totalorder %s46_s18, %s512_s14  ;;  %p518_p7 = scmp.lt.s32.totalorder %s512_s14, %s512_s14 }
  0x2e   :  { %p519_p8 = por %p518_p7, %p517_p6 }
  0x30   :  { %p520_p9 = pnand %p519_p8, %p513_p5 }
  0x32   :  { %523 = shalt.err (!%p520_p9)
}
  0x33   :  { %51 = dma.hbm_to_vmem [thread:$0]  %s710_s3, 256, %s46_s18, [#allocation6], %s577_s11, %s577_s11, %s578_s12  }
  0x34   :  { %s581_s16 = smov [#allocation8]   ;;  %s524_s21 = scalar_lea.hbm %s712_s5, 512 }
  0x35   :  { %s59_s17 = sshll.u32 %s581_s16, 4  ;;  %p525_p10 = scmp.ne.s32.totalorder %s712_s5, %s524_s21  ;;  %s60_s17 = int_to_ptr.vmem [resolvable:$true] %s59_s17 }
  0x36   :  { %p528_p11 = scmp.lt.u32.totalorder %s524_s21, %s712_s5 }
  0x38   :  { %p530_p12 = pnand %p528_p11, %p525_p10 }
  0x3a   :  { %533 = shalt.err (!%p530_p12)
}
  0x3b   :  { %s534_s1 = scalar_lea.vmem %s60_s17, 512  ;;  %p539_p0 = scmp.lt.s32.totalorder %s60_s17, %s60_s17 }
  0x3c   :  { %p535_p13 = scmp.ne.s32.totalorder %s60_s17, %s534_s1  ;;  %p540_p1 = scmp.lt.s32.totalorder %s534_s1, %s534_s1 }
  0x3e   :  { %p541_p2 = por %p540_p1, %p539_p0 }
  0x40   :  { %p542_p3 = pnand %p541_p2, %p535_p13 }
  0x42   :  { %545 = shalt.err (!%p542_p3)
}
  0x43   :  { %65 = dma.hbm_to_vmem [thread:$0]  %s712_s5, 512, %s60_s17, [#allocation9], %s577_s11, %s577_s11, %s578_s12  }
  0x44   :  { %568 = dma.done.wait [#allocation3], 64  }
  0x45   :  { %569 = vsyncadd [#allocation3], 4294967232 }
  0x46   :  { %570 = dma.done.wait [#allocation6], 512  }
  0x47   :  { %571 = vsyncadd [#allocation6], 4294966784 }
  0x48   :  { %572 = dma.done.wait [#allocation9], 512  }
  0x49   :  { %573 = vsyncadd [#allocation9], 4294966784  ;;  %v582_v0 = vmov 0.0|0.0   ;;  %vm583_vm0 = vmmov 0   ;;  %v584_v1 = vmov 0.0   ;;  %v81_v2 = vld [vmem:[#allocation5] sm:$0xff] }
  0x4a   :  { %429 = vmatprep.subr.bf16.mxu1 %v582_v0  ;;  %408 = vmatprep.mubr.msk.f32.mxu1 %vm583_vm0, %v584_v1  ;;  %v82_v3 = vld [vmem:[#allocation5 + $0x8] sm:$0xff]  ;;  %v80_v5 = vld [vmem:[#allocation2] sm:$0xf]  ;;  %vm98_vm1 = vcmask 130048   ;;  %v84_v6 = vld [vmem:[#allocation7] sm:$0xff]  ;;  %vm195_vm2 = vcmask 1046528  }
  0x4b   :  { %436 = vmatprep.subr.bf16.mxu0 %v582_v0  ;;  %426 = vmatprep.mubr.msk.f32.mxu0 %vm583_vm0, %v584_v1  ;;  %v430_v4 = vpack.c.bf16 %v82_v3, %v81_v2  ;;  %v85_v7 = vld [vmem:[#allocation7 + $0x8] sm:$0x7f]  ;;  %vm585_vm3 = vmmov 1   ;;  %vm174_vm5 = vcmask 117760   ;;  %vm191_vm6 = vcmask 121856   ;;  %v87_v25 = vld [vmem:[#allocation8] sm:$0xff] }
  0x4c   :  { %v433_v8 = vpack.c.bf16 %v85_v7, %v84_v6  ;;  %vm434_vm4 = vmpackc.low %vm195_vm2, %vm585_vm3  ;;  %v385_v9 = vld [vmem:[%s709_s2] ss:$0 sm:$0xff]  ;;  %v88_v26 = vld [vmem:[#allocation8 + $0x8] sm:$0xff]  ;;  %vm292_vm7 = vcmask 1045504   ;;  %vm271_vm9 = vcmask 240640   ;;  %vm288_vm10 = vcmask 244736  }
  0x4d   :  { %431 = vmatpush3.bf16.msra.mxu1 %v430_v4  ;;  %v437_v27 = vpack.c.bf16 %v88_v26, %v87_v25  ;;  %v89_v28 = vld [vmem:[#allocation8 + $0x10] sm:$0xff]  ;;  %v90_v29 = vld [vmem:[#allocation8 + $0x18] sm:$0x3f]  ;;  %vm441_vm8 = vmpackc.low %vm292_vm7, %vm585_vm3  ;;  %s586_s27 = smov [#allocation10]  }
  0x4e   :  { %432 = vmatprep.subr.bf16.mxu1 %v582_v0  ;;  %v440_v30 = vpack.c.bf16 %v90_v29, %v89_v28  ;;  %v387_v31 = vld [vmem:[%s711_s4] ss:$0 sm:$0xff]  ;;  %s374_s28 = sshll.u32 %s586_s27, 4  ;;  %s375_s28 = int_to_ptr.vmem [resolvable:$true] %s374_s28 }
  0x4f   :  { %438 = vmatpush3.bf16.msra.mxu0 %v437_v27  ;;  %v390_v47 = vld [vmem:[%s713_s6] ss:$0 sm:$0xff]  ;;  %s546_s29 = scalar_lea.vmem %s375_s28, 64  ;;  %p551_p5 = scmp.lt.s32.totalorder %s375_s28, %s375_s28 }
  0x50   :  { %409 = vmatmul.mubr.msk.f32.vlgmr.msra.gmra.mrb[0].mxu1 %vm98_vm1, %v80_v5  ;;  %439 = vmatprep.subr.bf16.mxu0 %v582_v0  ;;  %p547_p4 = scmp.ne.s32.totalorder %s375_s28, %s546_s29  ;;  %p552_p6 = scmp.lt.s32.totalorder %s546_s29, %s546_s29 }
  0x51   :  { %415 = vmatprep.mubr.msk.f32.mxu1 %vm583_vm0, %v584_v1  ;;  %435 = vmatpush3.bf16.msk.msra.mxu1 %vm434_vm4, %v433_v8 }
  0x52   :  { %p553_p7 = por %p552_p6, %p551_p5 }
  0x53   :  { %442 = vmatpush3.bf16.msk.msra.mxu0 %vm441_vm8, %v440_v30 }
  0x54   :  { %p554_p8 = pnand %p553_p7, %p547_p4 }
 0x123   :  { %v168_v10 = vpop.f32.mrb[0].mxu1 }
 0x124   :  { %v169_v11 = vadd.f32 %v385_v9, %v168_v10  ;;  %v410_v12 = vpop.f32.mrb[1].mxu1 }
 0x126   :  { %v172_v13 = vmax.f32 %v169_v11, 0.0 }
 0x128   :  { %v173_v14 = vmul.f32 %v172_v13, %v172_v13 }
 0x12a   :  { %v175_v15 = vsel %vm174_vm5, %v173_v14, 0.0 }
 0x12b   :  { %v176_v16 = vrot.slane %v175_v15, 4 }
 0x12d   :  { %v177_v17 = vadd.f32 %v176_v16, %v175_v15 }
 0x12f   :  { %v178_v18 = vrot.slane %v177_v17, 2 }
 0x131   :  { %v179_v19 = vadd.f32 %v178_v18, %v177_v17 }
 0x133   :  { %v180_v20 = vrot.slane %v179_v19, 1 }
 0x135   :  { %v181_v21 = vadd.f32 %v180_v20, %v179_v19 }
 0x137   :  { %v182_v22 = vmax.f32 %v181_v21, 1e-24 }
 0x139   :  { %454 = vrsqrt.f32 %v182_v22 }
 0x143   :  { %v455_v23 = vpop.eup %454 }
 0x144   :  { %v184_v24 = vmul.f32 %v455_v23, %v172_v13 }
 0x146   :  { %416 = vmatmul.mubr.msk.f32.vlgmr.msra.gmra.mrb[2].mxu1 %vm191_vm6, %v184_v24 }
 0x219   :  { %v265_v32 = vpop.f32.mrb[2].mxu1 }
 0x21a   :  { %v266_v33 = vadd.f32 %v387_v31, %v265_v32  ;;  %v417_v34 = vpop.f32.mrb[3].mxu1 }
 0x21c   :  { %v269_v35 = vmax.f32 %v266_v33, 0.0 }
 0x21e   :  { %v270_v36 = vmul.f32 %v269_v35, %v269_v35 }
 0x220   :  { %v272_v37 = vsel %vm271_vm9, %v270_v36, 0.0 }
 0x221   :  { %v273_v38 = vrot.slane %v272_v37, 4 }
 0x223   :  { %v274_v39 = vadd.f32 %v273_v38, %v272_v37 }
 0x225   :  { %v275_v40 = vrot.slane %v274_v39, 2 }
 0x227   :  { %v276_v41 = vadd.f32 %v275_v40, %v274_v39 }
 0x229   :  { %v277_v42 = vrot.slane %v276_v41, 1 }
 0x22b   :  { %v278_v43 = vadd.f32 %v277_v42, %v276_v41 }
 0x22d   :  { %v279_v44 = vmax.f32 %v278_v43, 1e-24 }
 0x22f   :  { %456 = vrsqrt.f32 %v279_v44 }
 0x239   :  { %v457_v45 = vpop.eup %456 }
 0x23a   :  { %v281_v46 = vmul.f32 %v457_v45, %v269_v35 }
 0x23c   :  { %427 = vmatmul.mubr.msk.f32.vlgmr.msra.gmra.mrb[0].mxu0 %vm288_vm10, %v281_v46 }
 0x30f   :  { %v362_v48 = vpop.f32.mrb[0].mxu0 }
 0x310   :  { %v363_v49 = vadd.f32 %v390_v47, %v362_v48  ;;  %v428_v50 = vpop.f32.mrb[1].mxu0 }
 0x312   :  { %v366_v51 = vmax.f32 %v363_v49, 0.0 }
 0x314   :  { %367 = vst [vmem:[#allocation10] sm:$0xf] %v366_v51 }
 0x315   :  { %557 = shalt.err (!%p554_p8)
}
 0x316   :  { %s558_s9 = scalar_lea.hbm %s714_s7, 64 }
 0x317   :  { %p559_p9 = scmp.ne.s32.totalorder %s714_s7, %s558_s9  ;;  %p562_p10 = scmp.lt.u32.totalorder %s558_s9, %s714_s7 }
 0x319   :  { %p564_p11 = pnand %p562_p10, %p559_p9 }
 0x31b   :  { %567 = shalt.err (!%p564_p11)
}
 0x31c   :  { %377 = dma.vmem_to_hbm [thread:$0]  %s375_s28, 64, %s714_s7, [#allocation4]  }
 0x31d   :  { %574 = dma.done.wait [#allocation4], 64  }
 0x31e   :  { %575 = vsyncadd [#allocation4], 4294967232 }
 0x31f   :  { %381 = vsyncpa [#allocation3], 1 }
 0x320   :  { %382 = vsyncpa [#allocation6], 1 }
 0x321   :  { %383 = vsyncpa [#allocation9], 1 }
 0x322   :  { %384 = vsyncpa [#allocation4], 1 }

</bundles_post_ra>
